<compile_context>
chip_gen: v7x
topology: tpu7x:2x2x1
jax: 0.10.0
libtpu: 0.0.40
codegen_flags: <defaults>
</compile_context>

<pallas_src>
import jax
import jax.numpy as jnp
from jax.experimental import pallas as pl
from jax.experimental.pallas import tpu as pltpu

NORM_EPS = 1e-12  # F.normalize default eps


def _linear_relu(x, w, b):
    """y = relu(x @ w.T + b); w is PyTorch-layout (out, in), b is (1, out)."""
    y = jax.lax.dot_general(
        x, w,
        dimension_numbers=(((1,), (1,)), ((), ())),   # contract in-dim of both
        preferred_element_type=jnp.float32,
    )
    return jnp.maximum(y + b, 0.0)


def _make_attention_kernel(num_layers):
    """Builds a fused kernel for a fixed number of Linear+ReLU layers."""

    def kernel(x0_ref, x1_ref, *rest):
        # rest = (w0, b0, w1, b1, ..., w_{L-1}, b_{L-1}, out_ref)
        out_ref = rest[-1]
        wb_refs = rest[:-1]

        x0 = x0_ref[...]
        x1 = x1_ref[...]

        # Shared MLP applied to both branches (same weights, as in the module).
        for l in range(num_layers):
            w = wb_refs[2 * l][...]        # (out_l, in_l)
            b = wb_refs[2 * l + 1][...]    # (1, out_l)
            x0 = _linear_relu(x0, w, b)
            x1 = _linear_relu(x1, w, b)

        # x = x0 @ x1.T  -> (N0, N1), contraction over the hidden dim (MXU).
        s = jax.lax.dot_general(
            x0, x1,
            dimension_numbers=(((1,), (1,)), ((), ())),
            preferred_element_type=jnp.float32,
        )

        # tanh(mean over dim 1), keep as a column vector (N0, 1).
        t = jnp.tanh(jnp.mean(s, axis=1, keepdims=True))

        # F.normalize(t, p=2, dim=1, eps=1e-12): dim 1 has size 1, so the
        # L2 norm is |t| per row.
        out_ref[...] = t / jnp.maximum(jnp.abs(t), NORM_EPS)

    return kernel


def attention_forward(x0, x1, weights, biases):
    """JAX/Pallas equivalent of Attention.forward(x0, x1).

    x0: (N0, input_dim), x1: (N1, input_dim)
    weights[l]: (out_l, in_l) PyTorch Linear layout
    biases[l]:  (out_l,)
    Returns (N0, 1) float32.
    """
    assert len(weights) == len(biases)
    num_layers = len(weights)
    n0 = x0.shape[0]

    vmem = pl.BlockSpec(memory_space=pltpu.MemorySpace.VMEM)

    args = [x0.astype(jnp.float32), x1.astype(jnp.float32)]
    for w, b in zip(weights, biases):
        args.append(w.astype(jnp.float32))                # (out, in)
        args.append(b.reshape(1, -1).astype(jnp.float32)) # (1, out) row broadcast

    kernel = _make_attention_kernel(num_layers)
    return pl.pallas_call(
        kernel,
        out_shape=jax.ShapeDtypeStruct((n0, 1), jnp.float32),
        in_specs=[vmem] * len(args),
        out_specs=vmem,
    )(*args)


def _attention_ref(x0, x1, weights, biases):
    """Pure-JAX reference mirroring the PyTorch module."""
    x0 = x0.astype(jnp.float32)
    x1 = x1.astype(jnp.float32)
    for w, b in zip(weights, biases):
        x0 = jnp.maximum(x0 @ w.T + b, 0.0)
        x1 = jnp.maximum(x1 @ w.T + b, 0.0)
    x = x0 @ x1.T
    t = jnp.tanh(jnp.mean(x, axis=1))[:, None]
    norm = jnp.maximum(
        jnp.sqrt(jnp.sum(t * t, axis=1, keepdims=True)), NORM_EPS)
    return t / norm


if __name__ == "__main__":
    key = jax.random.PRNGKey(0)
    k_x0, k_x1, k_w0, k_b0, k_w1, k_b1 = jax.random.split(key, 6)

    # Small shapes consistent with the module:
    #   Attention(input_dim=32, linears=[32, 16], dropout=0.1)
    #   x0: (8, 32), x1: (8, 32)
    n0, n1 = 8, 8
    input_dim = 32
    linears = [32, 16]
    dims = [input_dim] + linears

    x0 = jax.random.normal(k_x0, (n0, input_dim), jnp.float32)
    x1 = jax.random.normal(k_x1, (n1, input_dim), jnp.float32)

    # Deterministic Linear params (PyTorch layout: weight (out, in), bias (out,)).
    w0 = jax.random.normal(k_w0, (dims[1], dims[0]), jnp.float32) * 0.2
    b0 = jax.random.normal(k_b0, (dims[1],), jnp.float32) * 0.1
    w1 = jax.random.normal(k_w1, (dims[2], dims[1]), jnp.float32) * 0.2
    b1 = jax.random.normal(k_b1, (dims[2],), jnp.float32) * 0.1
    weights = [w0, w1]
    biases = [b0, b1]

    out = attention_forward(x0, x1, weights, biases)
    out = jax.block_until_ready(out)

    assert out.shape == (n0, 1), out.shape
    assert out.dtype == jnp.float32

    ref = _attention_ref(x0, x1, weights, biases)
    assert bool(jnp.all(jnp.isfinite(out)))
    assert bool(jnp.allclose(out, ref, atol=1e-5, rtol=1e-5)), (
        float(jnp.max(jnp.abs(out - ref))))
    # Normalized 1-element rows are +/-1 (or 0 if tanh(mean) == 0).
    assert bool(jnp.all(jnp.abs(out) <= 1.0 + 1e-6))

    print("KERNEL_OK")
</pallas_src>

<mosaic_0001>
module attributes {stable_mosaic.version = 11 : i64} {
  func.func @kernel(%arg0: memref<8x32xf32, #tpu.memory_space<vmem>>, %arg1: memref<8x32xf32, #tpu.memory_space<vmem>>, %arg2: memref<32x32xf32, #tpu.memory_space<vmem>>, %arg3: memref<1x32xf32, #tpu.memory_space<vmem>>, %arg4: memref<16x32xf32, #tpu.memory_space<vmem>>, %arg5: memref<1x16xf32, #tpu.memory_space<vmem>>, %arg6: memref<8x1xf32, #tpu.memory_space<vmem>>) attributes {dimension_semantics = [], scalar_prefetch = 0 : i64, scratch_operands = 0 : i64, tpu.core_type = #tpu.core_type<tc>} {
    %c0 = arith.constant 0 : index
    %c0_0 = arith.constant 0 : index
    %0 = vector.load %arg0[%c0, %c0_0] : memref<8x32xf32, #tpu.memory_space<vmem>>, vector<8x32xf32>
    %c0_1 = arith.constant 0 : index
    %c0_2 = arith.constant 0 : index
    %1 = vector.load %arg1[%c0_1, %c0_2] : memref<8x32xf32, #tpu.memory_space<vmem>>, vector<8x32xf32>
    %c0_3 = arith.constant 0 : index
    %c0_4 = arith.constant 0 : index
    %2 = vector.load %arg2[%c0_3, %c0_4] : memref<32x32xf32, #tpu.memory_space<vmem>>, vector<32x32xf32>
    %c0_5 = arith.constant 0 : index
    %c0_6 = arith.constant 0 : index
    %3 = vector.load %arg3[%c0_5, %c0_6] : memref<1x32xf32, #tpu.memory_space<vmem>>, vector<1x32xf32>
    %cst = arith.constant dense<0.000000e+00> : vector<8x32xf32>
    %4 = tpu.matmul %0, %2, %cst {dimension_numbers = #tpu.dot_dimension_numbers<[1], [1], [0], [0], [0, 0, 1, 0], [], []>} : vector<8x32xf32>, vector<32x32xf32>, vector<8x32xf32> -> vector<8x32xf32>
    %5 = vector.broadcast %3 : vector<1x32xf32> to vector<8x32xf32>
    %6 = arith.addf %4, %5 : vector<8x32xf32>
    %cst_7 = arith.constant 0.000000e+00 : f32
    %7 = vector.broadcast %cst_7 : f32 to vector<8x32xf32>
    %8 = arith.maximumf %6, %7 : vector<8x32xf32>
    %cst_8 = arith.constant dense<0.000000e+00> : vector<8x32xf32>
    %9 = tpu.matmul %1, %2, %cst_8 {dimension_numbers = #tpu.dot_dimension_numbers<[1], [1], [0], [0], [0, 0, 1, 0], [], []>} : vector<8x32xf32>, vector<32x32xf32>, vector<8x32xf32> -> vector<8x32xf32>
    %10 = vector.broadcast %3 : vector<1x32xf32> to vector<8x32xf32>
    %11 = arith.addf %9, %10 : vector<8x32xf32>
    %cst_9 = arith.constant 0.000000e+00 : f32
    %12 = vector.broadcast %cst_9 : f32 to vector<8x32xf32>
    %13 = arith.maximumf %11, %12 : vector<8x32xf32>
    %c0_10 = arith.constant 0 : index
    %c0_11 = arith.constant 0 : index
    %14 = vector.load %arg4[%c0_10, %c0_11] : memref<16x32xf32, #tpu.memory_space<vmem>>, vector<16x32xf32>
    %c0_12 = arith.constant 0 : index
    %c0_13 = arith.constant 0 : index
    %15 = vector.load %arg5[%c0_12, %c0_13] : memref<1x16xf32, #tpu.memory_space<vmem>>, vector<1x16xf32>
    %cst_14 = arith.constant dense<0.000000e+00> : vector<8x16xf32>
    %16 = tpu.matmul %8, %14, %cst_14 {dimension_numbers = #tpu.dot_dimension_numbers<[1], [1], [0], [0], [0, 0, 1, 0], [], []>} : vector<8x32xf32>, vector<16x32xf32>, vector<8x16xf32> -> vector<8x16xf32>
    %17 = vector.broadcast %15 : vector<1x16xf32> to vector<8x16xf32>
    %18 = arith.addf %16, %17 : vector<8x16xf32>
    %cst_15 = arith.constant 0.000000e+00 : f32
    %19 = vector.broadcast %cst_15 : f32 to vector<8x16xf32>
    %20 = arith.maximumf %18, %19 : vector<8x16xf32>
    %cst_16 = arith.constant dense<0.000000e+00> : vector<8x16xf32>
    %21 = tpu.matmul %13, %14, %cst_16 {dimension_numbers = #tpu.dot_dimension_numbers<[1], [1], [0], [0], [0, 0, 1, 0], [], []>} : vector<8x32xf32>, vector<16x32xf32>, vector<8x16xf32> -> vector<8x16xf32>
    %22 = vector.broadcast %15 : vector<1x16xf32> to vector<8x16xf32>
    %23 = arith.addf %21, %22 : vector<8x16xf32>
    %cst_17 = arith.constant 0.000000e+00 : f32
    %24 = vector.broadcast %cst_17 : f32 to vector<8x16xf32>
    %25 = arith.maximumf %23, %24 : vector<8x16xf32>
    %cst_18 = arith.constant dense<0.000000e+00> : vector<8x8xf32>
    %26 = tpu.matmul %20, %25, %cst_18 {dimension_numbers = #tpu.dot_dimension_numbers<[1], [1], [0], [0], [0, 0, 1, 0], [], []>} : vector<8x16xf32>, vector<8x16xf32>, vector<8x8xf32> -> vector<8x8xf32>
    %cst_19 = arith.constant dense<0.000000e+00> : vector<8xf32>
    %27 = vector.multi_reduction <add>, %26, %cst_19 [1] : vector<8x8xf32> to vector<8xf32>
    %28 = vector.shape_cast %27 : vector<8xf32> to vector<8x1xf32>
    %cst_20 = arith.constant 8.000000e+00 : f32
    %29 = vector.broadcast %cst_20 : f32 to vector<8x1xf32>
    %30 = arith.divf %28, %29 : vector<8x1xf32>
    %31 = math.tanh %30 : vector<8x1xf32>
    %32 = math.absf %31 : vector<8x1xf32>
    %cst_21 = arith.constant 9.99999996E-13 : f32
    %33 = vector.broadcast %cst_21 : f32 to vector<8x1xf32>
    %34 = arith.maximumf %32, %33 : vector<8x1xf32>
    %35 = arith.divf %31, %34 : vector<8x1xf32>
    %c0_22 = arith.constant 0 : index
    %c0_23 = arith.constant 0 : index
    %36 = vector.load %arg6[%c0_22, %c0_23] : memref<8x1xf32, #tpu.memory_space<vmem>>, vector<8x1xf32>
    tpu.vector_store %arg6[%c0_22, %c0_23], %35 {strides = array<i32>} : memref<8x1xf32, #tpu.memory_space<vmem>>, vector<8x1xf32>,
    return
  }
}

</mosaic_0001>

<bundles_post_ra>
// kernel: tpu_custom_call.1
= control target key start
LH: loop header
LB: loop body
LE: loop exit
PB: predicated region body
PF: predicated region fallthrough
CT: control target
= control target key end

     0   :  { %11 = vsyncpa [#allocation3], 0  ;;  %s846_s0 = inlined_call_operand.hbm [shape: f32[8,32], index: 0, kind: input, shape index: {}]   ;;  %s847_s1 = inlined_call_operand.hbm [shape: f32[8,32], index: 1, kind: input, shape index: {}]   ;;  %s848_s2 = inlined_call_operand.hbm [shape: f32[32,32], index: 2, kind: input, shape index: {}]   ;;  %s849_s3 = inlined_call_operand.vmem [shape: f32[1,32], index: 3, kind: input, shape index: {}]   ;;  %s850_s4 = inlined_call_operand.hbm [shape: f32[16,32], index: 4, kind: input, shape index: {}]   ;;  %s851_s5 = inlined_call_operand.vmem [shape: f32[1,16], index: 5, kind: input, shape index: {}]   ;;  %s852_s6 = inlined_call_operand.vmem [shape: f32[8,1], index: 6, kind: output, shape index: {}]  }
   0x1   :  { %12 = vsyncpa [#allocation5], 0 }
   0x2   :  { %13 = vsyncpa [#allocation8], 0  ;;  %s718_s21 = smov [#allocation4]   ;;  %s719_s23 = smov [#allocation2]  }
   0x3   :  { %s30_s22 = sshll.u32 %s718_s21, 4  ;;  %s20_s24 = sshll.u32 %s719_s23, 4  ;;  %s31_s22 = int_to_ptr.vmem [resolvable:$true] %s30_s22  ;;  %s21_s24 = int_to_ptr.vmem [resolvable:$true] %s20_s24 }
   0x4   :  { %s624_s27 = scalar_lea.hbm %s847_s1, 128 }
   0x5   :  { %p625_p0 = scmp.ne.s32.totalorder %s847_s1, %s624_s27  ;;  %p628_p1 = scmp.lt.u32.totalorder %s624_s27, %s847_s1 }
   0x7   :  { %p630_p2 = pnand %p628_p1, %p625_p0 }
   0x9   :  { %633 = shalt.err (!%p630_p2)
}
   0xa   :  { %s634_s8 = scalar_lea.vmem %s31_s22, 128  ;;  %p639_p4 = scmp.lt.s32.totalorder %s31_s22, %s31_s22 }
   0xb   :  { %p635_p3 = scmp.ne.s32.totalorder %s31_s22, %s634_s8  ;;  %p640_p5 = scmp.lt.s32.totalorder %s634_s8, %s634_s8 }
   0xd   :  { %p641_p6 = por %p640_p5, %p639_p4 }
   0xf   :  { %p642_p7 = pnand %p641_p6, %p635_p3 }
  0x11   :  { %645 = shalt.err (!%p642_p7)
}
  0x12   :  { %33 = dma.hbm_to_vmem [thread:$0]  %s847_s1, 128, %s31_s22, [#allocation5]  }
  0x13   :  { %s646_s13 = scalar_lea.hbm %s846_s0, 128 }
  0x14   :  { %p647_p8 = scmp.ne.s32.totalorder %s846_s0, %s646_s13  ;;  %p650_p9 = scmp.lt.u32.totalorder %s646_s13, %s846_s0 }
  0x16   :  { %p652_p10 = pnand %p650_p9, %p647_p8 }
  0x18   :  { %655 = shalt.err (!%p652_p10)
}
  0x19   :  { %s656_s18 = scalar_lea.vmem %s21_s24, 128  ;;  %p661_p12 = scmp.lt.s32.totalorder %s21_s24, %s21_s24 }
  0x1a   :  { %p657_p11 = scmp.ne.s32.totalorder %s21_s24, %s656_s18  ;;  %p662_p13 = scmp.lt.s32.totalorder %s656_s18, %s656_s18 }
  0x1c   :  { %p663_p0 = por %p662_p13, %p661_p12 }
  0x1e   :  { %p664_p1 = pnand %p663_p0, %p657_p11 }
  0x20   :  { %667 = shalt.err (!%p664_p1)
}
  0x21   :  { %23 = dma.hbm_to_vmem [thread:$0]  %s846_s0, 128, %s21_s24, [#allocation3]  }
  0x22   :  { %s720_s20 = smov [#allocation6]   ;;  %s668_s25 = scalar_lea.hbm %s848_s2, 512 }
  0x23   :  { %s39_s21 = sshll.u32 %s720_s20, 4  ;;  %p669_p2 = scmp.ne.s32.totalorder %s848_s2, %s668_s25  ;;  %s40_s21 = int_to_ptr.vmem [resolvable:$true] %s39_s21 }
  0x24   :  { %p672_p3 = scmp.lt.u32.totalorder %s668_s25, %s848_s2 }
  0x26   :  { %p674_p4 = pnand %p672_p3, %p669_p2 }
  0x28   :  { %677 = shalt.err (!%p674_p4)
}
  0x29   :  { %s678_s30 = scalar_lea.vmem %s40_s21, 512  ;;  %p683_p6 = scmp.lt.s32.totalorder %s40_s21, %s40_s21 }
  0x2a   :  { %p679_p5 = scmp.ne.s32.totalorder %s40_s21, %s678_s30  ;;  %p684_p7 = scmp.lt.s32.totalorder %s678_s30, %s678_s30 }
  0x2c   :  { %p685_p8 = por %p684_p7, %p683_p6 }
  0x2e   :  { %p686_p9 = pnand %p685_p8, %p679_p5 }
  0x30   :  { %689 = shalt.err (!%p686_p9)
}
  0x31   :  { %s721_s0 = smov 128   ;;  %s722_s24 = smov 8  }
  0x32   :  { %45 = dma.hbm_to_vmem [thread:$0]  %s848_s2, 512, %s40_s21, [#allocation5], %s721_s0, %s721_s0, %s722_s24  }
  0x33   :  { %s723_s9 = smov [#allocation7]   ;;  %s690_s13 = scalar_lea.hbm %s850_s4, 256 }
  0x34   :  { %s53_s10 = sshll.u32 %s723_s9, 4  ;;  %p691_p10 = scmp.ne.s32.totalorder %s850_s4, %s690_s13  ;;  %s54_s10 = int_to_ptr.vmem [resolvable:$true] %s53_s10 }
  0x35   :  { %p694_p11 = scmp.lt.u32.totalorder %s690_s13, %s850_s4 }
  0x37   :  { %p696_p12 = pnand %p694_p11, %p691_p10 }
  0x39   :  { %699 = shalt.err (!%p696_p12)
}
  0x3a   :  { %s700_s18 = scalar_lea.vmem %s54_s10, 256  ;;  %p705_p0 = scmp.lt.s32.totalorder %s54_s10, %s54_s10 }
  0x3b   :  { %p701_p13 = scmp.ne.s32.totalorder %s54_s10, %s700_s18  ;;  %p706_p1 = scmp.lt.s32.totalorder %s700_s18, %s700_s18 }
  0x3d   :  { %p707_p2 = por %p706_p1, %p705_p0 }
  0x3f   :  { %p708_p3 = pnand %p707_p2, %p701_p13 }
  0x41   :  { %711 = shalt.err (!%p708_p3)
}
  0x42   :  { %59 = dma.hbm_to_vmem [thread:$0]  %s850_s4, 256, %s54_s10, [#allocation8], %s721_s0, %s721_s0, %s722_s24  }
  0x43   :  { %712 = dma.done.wait [#allocation3], 128  }
  0x44   :  { %713 = vsyncadd [#allocation3], 4294967168 }
  0x45   :  { %714 = dma.done.wait [#allocation5], 640  }
  0x46   :  { %715 = vsyncadd [#allocation5], 4294966656 }
  0x47   :  { %716 = dma.done.wait [#allocation8], 256  }
  0x48   :  { %717 = vsyncadd [#allocation8], 4294967040  ;;  %v724_v0 = vmov 0.0|0.0   ;;  %vm725_vm0 = vmmov 0   ;;  %v726_v1 = vmov 0.0   ;;  %vm87_vm1 = vcmask 261120  }
  0x49   :  { %595 = vmatprep.subr.bf16.mxu1 %v724_v0  ;;  %587 = vmatprep.subr.bf16.mxu0 %v724_v0  ;;  %v76_v2 = vld [vmem:[#allocation6] sm:$0xff]  ;;  %v77_v3 = vld [vmem:[#allocation6 + $0x8] sm:$0xff]  ;;  %vm814_vm2 = vmpackc.low %vm87_vm1, %vm87_vm1  ;;  %vm411_vm3 = vcmask 130048   ;;  %vm488_vm4 = vcmask 64512   ;;  %vm499_vm5 = vcmask 7168  }
  0x4a   :  { %565 = vmatprep.mubr.msk.f32.mxu1 %vm725_vm0, %v726_v1  ;;  %554 = vmatprep.mubr.msk.f32.mxu0 %vm725_vm0, %v726_v1  ;;  %v588_v5 = vpack.c.bf16 %v77_v3, %v76_v2  ;;  %v78_v6 = vld [vmem:[#allocation6 + $0x10] sm:$0xff]  ;;  %v79_v7 = vld [vmem:[#allocation6 + $0x18] sm:$0xff]  ;;  %v248_v9 = vld [vmem:[#allocation7] sm:$0xff] }
  0x4b   :  { %v592_v8 = vpack.c.bf16 %v79_v7, %v78_v6  ;;  %v249_v10 = vld [vmem:[#allocation7 + $0x8] sm:$0xff]  ;;  %v75_v11 = vld [vmem:[#allocation4] sm:$0xff]  ;;  %v74_v12 = vld [vmem:[#allocation2] sm:$0xff] }
  0x4c   :  { %598 = vmatpush3.bf16.xpose.msk.msra.mxu1 %vm814_vm2, %v588_v5  ;;  %590 = vmatpush3.bf16.xpose.msk.msra.mxu0 %vm814_vm2, %v588_v5  ;;  %v604_v13 = vpack.c.bf16 %v249_v10, %v248_v9  ;;  %v508_v14 = vld [vmem:[%s849_s3] ss:$0 sm:$0xff] }
  0x4d   :  { %599 = vmatprep.subr.bf16.mxu1 %v724_v0  ;;  %591 = vmatprep.subr.bf16.mxu0 %v724_v0  ;;  %v519_v23 = vld [vmem:[%s851_s5] ss:$0 sm:$0xff] }
  0x54   :  { %602 = vmatpush3.bf16.xpose.msk.msra.mxu1 %vm814_vm2, %v592_v8  ;;  %594 = vmatpush3.bf16.xpose.msk.msra.mxu0 %vm814_vm2, %v592_v8 }
  0x55   :  { %607 = vmatprep.subr.bf16.mxu1 %v724_v0  ;;  %603 = vmatprep.subr.bf16.mxu0 %v724_v0 }
  0x5b   :  { %566 = vmatmul.mubr.msk.f32.vlgmr.msra.gmra.mrb[0].mxu1 %vm87_vm1, %v75_v11  ;;  %555 = vmatmul.mubr.msk.f32.vlgmr.msra.gmra.mrb[0].mxu0 %vm87_vm1, %v74_v12 }
  0x5c   :  { %610 = vmatpush3.bf16.xpose.msk.msra.mxu1 %vm814_vm2, %v604_v13  ;;  %606 = vmatpush3.bf16.xpose.msk.msra.mxu0 %vm814_vm2, %v604_v13 }
  0x5d   :  { %579 = vmatprep.mubr.msk.f32.mxu1 %vm725_vm0, %v726_v1  ;;  %572 = vmatprep.mubr.msk.f32.mxu0 %vm725_vm0, %v726_v1 }
  0x5e   :  { %582 = vmatprep.subr.mxu0 %v726_v1 }
 0x12e   :  { %v243_v15 = vpop.f32.mrb[0].mxu1  ;;  %v169_v16 = vpop.f32.mrb[0].mxu0 }
 0x12f   :  { %v244_v17 = vadd.f32 %v508_v14, %v243_v15  ;;  %v567_v18 = vpop.f32.mrb[1].mxu1  ;;  %v170_v19 = vadd.f32 %v508_v14, %v169_v16  ;;  %v556_v20 = vpop.f32.mrb[1].mxu0 }
 0x131   :  { %v247_v21 = vmax.f32 %v244_v17, 0.0  ;;  %v173_v22 = vmax.f32 %v170_v19, 0.0 }
 0x133   :  { %580 = vmatmul.mubr.msk.f32.vlgmr.msra.gmra.mrb[2].mxu1 %vm87_vm1, %v247_v21  ;;  %573 = vmatmul.mubr.msk.f32.vlgmr.msra.gmra.mrb[2].mxu0 %vm87_vm1, %v173_v22 }
 0x134   :  { %584 = vmatprep.mubr.msk.f32.mxu0 %vm725_vm0, %v726_v1 }
 0x206   :  { %v406_v24 = vpop.f32.mrb[2].mxu1  ;;  %v332_v25 = vpop.f32.mrb[2].mxu0 }
 0x207   :  { %v407_v26 = vadd.f32 %v519_v23, %v406_v24  ;;  %v581_v27 = vpop.f32.mrb[3].mxu1  ;;  %v333_v28 = vadd.f32 %v519_v23, %v332_v25  ;;  %v574_v29 = vpop.f32.mrb[3].mxu0 }
 0x209   :  { %v410_v30 = vmax.f32 %v407_v26, 0.0  ;;  %v336_v31 = vmax.f32 %v333_v28, 0.0 }
 0x20b   :  { %583 = vmatpush3.xpose.msk.msra.mxu0 %vm411_vm3, %v410_v30 }
 0x20e   :  { %585 = vmatmul.mubr.msk.f32.vlgmr.msra.gmra.mrb[4].mxu0 %vm411_vm3, %v336_v31 }
 0x2e1   :  { %v484_v32 = vpop.f32.mrb[4].mxu0 }
 0x2e2   :  { %v586_v33 = vpop.f32.mrb[5].mxu0  ;;  %v489_v34 = vsel %vm488_vm4, %v484_v32, 0.0 }
 0x2e3   :  { %490 = vadd.xlane.f32.xlu0 %v489_v34 }
 0x370   :  { %v491_v35 = vpop.xlane.xlu0 %490 }
 0x371   :  { %v493_v36 = vmul.f32 0.125, %v491_v35 }
 0x373   :  { %620 = vtanh.f32 %v493_v36 }
 0x37d   :  { %v621_v37 = vpop.eup %620 }
 0x37e   :  { %v495_v38 = vand.u32 2147483647, %v621_v37 }
 0x380   :  { %v496_v39 = vmax.f32 %v495_v38, 1e-12 }
 0x382   :  { %622 = vrcp.f32 %v496_v39 }
 0x38c   :  { %v623_v40 = vpop.eup %622 }
 0x38d   :  { %v498_v41 = vmul.f32 %v623_v40, %v621_v37 }
 0x38f   :  { %500 = vst.msk [vmem:[%s852_s6] sm:$0xff] %vm499_vm5, %v498_v41 }
 0x390   :  { %505 = vsyncpa [#allocation3], 1 }
 0x391   :  { %506 = vsyncpa [#allocation5], 1 }
 0x392   :  { %507 = vsyncpa [#allocation8], 1 }

</bundles_post_ra>
